<compile_context>
chip_gen: v7x
topology: tpu7x:2x2x1
jax: 0.10.0
libtpu: 0.0.40
codegen_flags: <defaults>
</compile_context>

<pallas_src>
import functools

import jax
import jax.numpy as jnp
from jax.experimental import pallas as pl
from jax.experimental.pallas import tpu as pltpu

_LANE = 128    # feature dims padded to lane width -> unmasked, lane-dense stores
_SUB = 512     # tile granularity on node axes (>=512 ~ 85% of HBM roofline)
_TILE = 2048   # max tile edge: ~26 MiB live VMEM at F_p<=256, fits v7x's 64 MiB


def _round_up(v, m):
    return (v + m - 1) // m * m


def _pad2(a, rows, cols):
    return jnp.pad(a, ((0, rows - a.shape[0]), (0, cols - a.shape[1])))


def _pick_tiles(n_pad):
    """Largest _SUB*2^j tiles dividing n_pad, capped at _TILE.

    The row-block axis additionally keeps >= 2 blocks when possible so the
    'parallel' grid dimension can shard across v7x's two TensorCores.
    """
    if n_pad <= _SUB:
        return n_pad, n_pad

    def biggest(cap):
        t = _SUB
        while t * 2 <= cap and n_pad % (t * 2) == 0:
            t *= 2
        return t

    tk = biggest(_TILE)
    tm = biggest(_TILE)
    if n_pad // tm < 2 and tm > _SUB:
        tm //= 2
    return tm, tk


def _fused_sage_layer_kernel(a_ref, xk_ref, inv_ref, xself_ref, w_ref, b_ref,
                             out_ref, acc_ref, *, apply_relu):
    """One fused SAGEConv(mean) layer.

    out = ((A @ X) * inv_deg) @ W_l + X_self @ W_r + b   (optional ReLU)

    Grid = (row blocks of A, reduction blocks over A's columns). The aggregation
    matmul runs bf16 x bf16 on the MXU with an f32 VMEM accumulator; the packed
    linear (lin_l & lin_r, and for the second layer both mu & logstd heads) runs at
    the last reduction step as two dots on static slices of the packed weight ref.
    """
    k = pl.program_id(1)

    @pl.when(k == 0)
    def _():
        acc_ref[...] = jnp.zeros_like(acc_ref)

    # bf16 x bf16 -> f32 accumulate (native MXU path; no per-step upcast of A).
    acc_ref[...] += jnp.dot(a_ref[...], xk_ref[...],
                            preferred_element_type=jnp.float32)

    @pl.when(k == pl.num_programs(1) - 1)
    def _():
        f_p = xself_ref.shape[-1]
        # mean = sum * (1/deg) on the VPU, re-narrowed to bf16 for the MXU.
        agg = (acc_ref[...] * inv_ref[...]).astype(jnp.bfloat16)
        out = (jnp.dot(agg, w_ref[:f_p, :], preferred_element_type=jnp.float32)
               + jnp.dot(xself_ref[...], w_ref[f_p:, :],
                         preferred_element_type=jnp.float32)
               + b_ref[...])
        if apply_relu:
            out = jnp.maximum(out, 0.0)
        out_ref[...] = out.astype(out_ref.dtype)


def _sage_layer(cnt, inv_deg, feat, w_pack, b_pack, *, apply_relu, out_dtype):
    """Launch one fused SAGE layer over a tiled (row-block, reduction-block) grid."""
    n_pad, f_p = feat.shape
    f_out = w_pack.shape[1]
    tm, tk = _pick_tiles(n_pad)
    grid = (n_pad // tm, n_pad // tk)

    kernel = functools.partial(_fused_sage_layer_kernel, apply_relu=apply_relu)
    return pl.pallas_call(
        kernel,
        out_shape=jax.ShapeDtypeStruct((n_pad, f_out), out_dtype),
        grid_spec=pltpu.PrefetchScalarGridSpec(
            num_scalar_prefetch=0,
            grid=grid,
            in_specs=[
                pl.BlockSpec((tm, tk), lambda i, k: (i, k)),          # A counts (bf16)
                pl.BlockSpec((tk, f_p), lambda i, k: (k, 0)),         # features, agg chunk (bf16)
                pl.BlockSpec((tm, 1), lambda i, k: (i, 0)),           # 1 / in_degree (f32)
                pl.BlockSpec((tm, f_p), lambda i, k: (i, 0)),         # features, self rows (bf16)
                pl.BlockSpec((2 * f_p, f_out), lambda i, k: (0, 0)),  # packed weights (bf16)
                pl.BlockSpec((1, f_out), lambda i, k: (0, 0)),        # packed bias (f32)
            ],
            out_specs=pl.BlockSpec((tm, f_out), lambda i, k: (i, 0)),
            scratch_shapes=[pltpu.VMEM((tm, f_p), jnp.float32)],
        ),
        compiler_params=pltpu.CompilerParams(
            dimension_semantics=("parallel", "arbitrary"),
            vmem_limit_bytes=56 * 1024 * 1024,   # ~26 MiB live; below v7x's 64 MiB
        ),
    )(cnt, feat, inv_deg, feat, w_pack, b_pack)


def variational_graph_sage_encoder(x, edge_index, params):
    """Pallas-backed forward of VariationalGraphSageEncoder. Returns (mu, logstd)."""
    n = x.shape[0]
    in_c = x.shape[1]
    out_c = params["wm_l"].shape[1]
    hidden = 2 * out_c

    n_pad = _round_up(n, 16) if n < _SUB else _round_up(n, _SUB)
    f_in_p = _round_up(in_c, _LANE)
    hid_p = _round_up(hidden, _LANE)
    out2_p = _round_up(2 * out_c, _LANE)

    src, dst = edge_index[0], edge_index[1]
    # Edge-count operator built directly in padded bf16 (exact for parallel-edge
    # multiplicities <= 256); degree via an O(E) segment-sum -- no dense f32 NxN prep.
    # TODO(synk): for large sparse graphs replace the dense O(N^2) aggregation with
    # CSR/gather aggregation via PrefetchScalarGridSpec (O(E*F)).
    cnt_p = jnp.zeros((n_pad, n_pad), jnp.bfloat16).at[dst, src].add(
        jnp.ones(src.shape, jnp.bfloat16))
    deg = jnp.zeros((n_pad, 1), jnp.float32).at[dst, 0].add(
        jnp.ones(dst.shape, jnp.float32))
    inv_p = jnp.where(deg > 0.0, 1.0 / jnp.maximum(deg, 1.0), 0.0)

    x_p = _pad2(x.astype(jnp.float32), n_pad, f_in_p).astype(jnp.bfloat16)

    # Layer 1 packed weights [w1_l ; w1_r] -> lin_l + lin_r in one pass (bf16 MXU).
    w1 = jnp.zeros((2 * f_in_p, hid_p), jnp.float32)
    w1 = w1.at[:in_c, :hidden].set(params["w1_l"])
    w1 = w1.at[f_in_p:f_in_p + in_c, :hidden].set(params["w1_r"])
    w1 = w1.astype(jnp.bfloat16)
    b1 = jnp.zeros((1, hid_p), jnp.float32).at[:, :hidden].set(params["b1"])

    # Hidden activations emitted as bf16 so layer 2 streams bf16 features directly.
    h_p = _sage_layer(cnt_p, inv_p, x_p, w1, b1,
                      apply_relu=True, out_dtype=jnp.bfloat16)

    # Layer 2 packed weights [[wm_l, ws_l] ; [wm_r, ws_r]] -> mu & logstd in one
    # lane-dense slab, split outside the kernel.
    w2 = jnp.zeros((2 * hid_p, out2_p), jnp.float32)
    w2 = w2.at[:hidden, :out_c].set(params["wm_l"])
    w2 = w2.at[:hidden, out_c:2 * out_c].set(params["ws_l"])
    w2 = w2.at[hid_p:hid_p + hidden, :out_c].set(params["wm_r"])
    w2 = w2.at[hid_p:hid_p + hidden, out_c:2 * out_c].set(params["ws_r"])
    w2 = w2.astype(jnp.bfloat16)
    b2 = jnp.zeros((1, out2_p), jnp.float32)
    b2 = b2.at[:, :out_c].set(params["bm"])
    b2 = b2.at[:, out_c:2 * out_c].set(params["bs"])

    out_p = _sage_layer(cnt_p, inv_p, h_p, w2, b2,
                        apply_relu=False, out_dtype=jnp.float32)

    mu = out_p[:n, :out_c]
    logstd = out_p[:n, out_c:2 * out_c]
    return mu, logstd


def init_params(key, in_channels, out_channels):
    """Deterministic synthetic parameters matching the module's shapes."""
    hidden = 2 * out_channels
    ks = jax.random.split(key, 9)

    def glorot(k, fin, fout):
        lim = (6.0 / (fin + fout)) ** 0.5
        return jax.random.uniform(k, (fin, fout), jnp.float32, -lim, lim)

    return dict(
        # conv1: SAGEConv(in_channels, 2*out_channels)
        w1_l=glorot(ks[0], in_channels, hidden),
        w1_r=glorot(ks[1], in_channels, hidden),
        b1=0.1 * jax.random.normal(ks[2], (1, hidden), jnp.float32),
        # conv_mu: SAGEConv(2*out_channels, out_channels)
        wm_l=glorot(ks[3], hidden, out_channels),
        wm_r=glorot(ks[4], hidden, out_channels),
        bm=0.1 * jax.random.normal(ks[5], (1, out_channels), jnp.float32),
        # conv_logstd: SAGEConv(2*out_channels, out_channels)
        ws_l=glorot(ks[6], hidden, out_channels),
        ws_r=glorot(ks[7], hidden, out_channels),
        bs=0.1 * jax.random.normal(ks[8], (1, out_channels), jnp.float32),
    )


def _reference_forward(x, edge_index, params):
    """Pure-JAX f32 reference of the same math for correctness checking."""
    n = x.shape[0]
    src, dst = edge_index[0], edge_index[1]
    cnt = jnp.zeros((n, n), jnp.float32).at[dst, src].add(1.0)
    deg = cnt.sum(axis=1, keepdims=True)
    adj = jnp.where(deg > 0, cnt / jnp.maximum(deg, 1.0), 0.0)

    def sage(xin, wl, wr, b):
        return (adj @ xin) @ wl + xin @ wr + b

    h = jax.nn.relu(sage(x, params["w1_l"], params["w1_r"], params["b1"]))
    mu = sage(h, params["wm_l"], params["wm_r"], params["bm"])
    logstd = sage(h, params["ws_l"], params["ws_r"], params["bs"])
    return mu, logstd


if __name__ == "__main__":
    key = jax.random.PRNGKey(0)
    num_nodes, in_channels, out_channels, num_edges = 16, 8, 8, 48

    kx, ke, kp = jax.random.split(key, 3)
    x = jax.random.normal(kx, (num_nodes, in_channels), jnp.float32)
    edge_index = jax.random.randint(ke, (2, num_edges), 0, num_nodes, dtype=jnp.int32)
    params = init_params(kp, in_channels, out_channels)

    mu, logstd = jax.jit(variational_graph_sage_encoder)(x, edge_index, params)
    jax.block_until_ready((mu, logstd))

    mu_ref, logstd_ref = _reference_forward(x, edge_index, params)
    assert mu.shape == (num_nodes, out_channels)
    assert logstd.shape == (num_nodes, out_channels)
    # bf16 activations/weights on the MXU -> tolerance relaxed accordingly.
    assert jnp.allclose(mu, mu_ref, atol=5e-2, rtol=5e-2)
    assert jnp.allclose(logstd, logstd_ref, atol=5e-2, rtol=5e-2)

    print("KERNEL_OK")
</pallas_src>

<mosaic_0001>
module attributes {stable_mosaic.version = 11 : i64} {
  func.func private @main(%arg0: i32) attributes {dimension_semantics = [#tpu.dimension_semantics<core_parallel>], iteration_bounds = array<i64: 2>, tpu.core_type = #tpu.core_type<sc_scalar_subcore>, window_params = []} {
    return
  }
}

module attributes {stable_mosaic.version = 11 : i64} {
  func.func private @main(%arg0: i32) attributes {dimension_semantics = [#tpu.dimension_semantics<core_parallel>], iteration_bounds = array<i64: 2>, tpu.core_type = #tpu.core_type<sc_scalar_subcore>, window_params = []} {
    return
  }
}

module attributes {stable_mosaic.version = 11 : i64} {
  func.func @_fused_sage_layer_kernel(%arg0: i32, %arg1: i32, %arg2: memref<16x16xbf16, #tpu.memory_space<vmem>>, %arg3: memref<16x128xbf16, #tpu.memory_space<vmem>>, %arg4: memref<16x1xf32, #tpu.memory_space<vmem>>, %arg5: memref<16x128xbf16, #tpu.memory_space<vmem>>, %arg6: memref<256x128xbf16, #tpu.memory_space<vmem>>, %arg7: memref<1x128xf32, #tpu.memory_space<vmem>>, %arg8: memref<16x128xbf16, #tpu.memory_space<vmem>>, %arg9: memref<16x128xf32, #tpu.memory_space<vmem>>) attributes {dimension_semantics = [#tpu.dimension_semantics<parallel>, #tpu.dimension_semantics<arbitrary>], iteration_bounds = array<i64: 1, 1>, scalar_prefetch = 0 : i64, scratch_operands = 1 : i64, tpu.core_type = #tpu.core_type<tc>, window_params = [{transform_indices = @transform_0, window_bounds = array<i64: 16, 16>}, {transform_indices = @transform_1, window_bounds = array<i64: 16, 128>}, {transform_indices = @transform_2, window_bounds = array<i64: 16, 1>}, {transform_indices = @transform_3, window_bounds = array<i64: 16, 128>}, {pipeline_mode = #tpu.pipeline_mode<synchronous>, transform_indices = @transform_4, window_bounds = array<i64: 256, 128>}, {pipeline_mode = #tpu.pipeline_mode<synchronous>, transform_indices = @transform_5, window_bounds = array<i64: 1, 128>}, {transform_indices = @transform_6, window_bounds = array<i64: 16, 128>}]} {
    %c0_i32 = arith.constant 0 : i32
    %0 = arith.cmpi eq, %arg1, %c0_i32 : i32
    %1 = arith.extui %0 : i1 to i32
    %c0_i32_0 = arith.constant 0 : i32
    %2 = arith.cmpi ne, %1, %c0_i32_0 : i32
    scf.if %2 {
      %cst_10 = arith.constant 0.000000e+00 : f32
      %12 = vector.broadcast %cst_10 : f32 to vector<16x128xf32>
      %c0_11 = arith.constant 0 : index
      %c0_12 = arith.constant 0 : index
      %13 = vector.load %arg9[%c0_11, %c0_12] : memref<16x128xf32, #tpu.memory_space<vmem>>, vector<16x128xf32>
      tpu.vector_store %arg9[%c0_11, %c0_12], %12 {strides = array<i32>} : memref<16x128xf32, #tpu.memory_space<vmem>>, vector<16x128xf32>,
    } else {
    }
    %c0 = arith.constant 0 : index
    %c0_1 = arith.constant 0 : index
    %3 = vector.load %arg9[%c0, %c0_1] : memref<16x128xf32, #tpu.memory_space<vmem>>, vector<16x128xf32>
    %c0_2 = arith.constant 0 : index
    %c0_3 = arith.constant 0 : index
    %4 = vector.load %arg2[%c0_2, %c0_3] : memref<16x16xbf16, #tpu.memory_space<vmem>>, vector<16x16xbf16>
    %c0_4 = arith.constant 0 : index
    %c0_5 = arith.constant 0 : index
    %5 = vector.load %arg3[%c0_4, %c0_5] : memref<16x128xbf16, #tpu.memory_space<vmem>>, vector<16x128xbf16>
    %cst = arith.constant dense<0.000000e+00> : vector<16x128xf32>
    %6 = tpu.matmul %4, %5, %cst {dimension_numbers = #tpu.dot_dimension_numbers<[1], [0], [0], [1], [0, 0, 1, 1], [], []>} : vector<16x16xbf16>, vector<16x128xbf16>, vector<16x128xf32> -> vector<16x128xf32>
    %7 = arith.addf %3, %6 : vector<16x128xf32>
    %c0_6 = arith.constant 0 : index
    %c0_7 = arith.constant 0 : index
    %8 = vector.load %arg9[%c0_6, %c0_7] : memref<16x128xf32, #tpu.memory_space<vmem>>, vector<16x128xf32>
    tpu.vector_store %arg9[%c0_6, %c0_7], %7 {strides = array<i32>} : memref<16x128xf32, #tpu.memory_space<vmem>>, vector<16x128xf32>,
    %c0_i32_8 = arith.constant 0 : i32
    %9 = arith.cmpi eq, %arg1, %c0_i32_8 : i32
    %10 = arith.extui %9 : i1 to i32
    %c0_i32_9 = arith.constant 0 : i32
    %11 = arith.cmpi ne, %10, %c0_i32_9 : i32
    scf.if %11 {
      %c0_10 = arith.constant 0 : index
      %c0_11 = arith.constant 0 : index
      %12 = vector.load %arg9[%c0_10, %c0_11] : memref<16x128xf32, #tpu.memory_space<vmem>>, vector<16x128xf32>
      %c0_12 = arith.constant 0 : index
      %c0_13 = arith.constant 0 : index
      %13 = vector.load %arg4[%c0_12, %c0_13] : memref<16x1xf32, #tpu.memory_space<vmem>>, vector<16x1xf32>
      %14 = vector.broadcast %13 : vector<16x1xf32> to vector<16x128xf32>
      %15 = arith.mulf %12, %14 : vector<16x128xf32>
      %16 = arith.truncf %15 : vector<16x128xf32> to vector<16x128xbf16>
      %c0_14 = arith.constant 0 : index
      %c0_15 = arith.constant 0 : index
      %17 = vector.load %arg6[%c0_14, %c0_15] : memref<256x128xbf16, #tpu.memory_space<vmem>>, vector<128x128xbf16>
      %cst_16 = arith.constant dense<0.000000e+00> : vector<16x128xf32>
      %18 = tpu.matmul %16, %17, %cst_16 {dimension_numbers = #tpu.dot_dimension_numbers<[1], [0], [0], [1], [0, 0, 1, 1], [], []>} : vector<16x128xbf16>, vector<128x128xbf16>, vector<16x128xf32> -> vector<16x128xf32>
      %c0_17 = arith.constant 0 : index
      %c0_18 = arith.constant 0 : index
      %19 = vector.load %arg5[%c0_17, %c0_18] : memref<16x128xbf16, #tpu.memory_space<vmem>>, vector<16x128xbf16>
      %c128 = arith.constant 128 : index
      %c0_19 = arith.constant 0 : index
      %20 = vector.load %arg6[%c128, %c0_19] : memref<256x128xbf16, #tpu.memory_space<vmem>>, vector<128x128xbf16>
      %cst_20 = arith.constant dense<0.000000e+00> : vector<16x128xf32>
      %21 = tpu.matmul %19, %20, %cst_20 {dimension_numbers = #tpu.dot_dimension_numbers<[1], [0], [0], [1], [0, 0, 1, 1], [], []>} : vector<16x128xbf16>, vector<128x128xbf16>, vector<16x128xf32> -> vector<16x128xf32>
      %22 = arith.addf %18, %21 : vector<16x128xf32>
      %c0_21 = arith.constant 0 : index
      %c0_22 = arith.constant 0 : index
      %23 = vector.load %arg7[%c0_21, %c0_22] : memref<1x128xf32, #tpu.memory_space<vmem>>, vector<1x128xf32>
      %24 = vector.broadcast %23 : vector<1x128xf32> to vector<16x128xf32>
      %25 = arith.addf %22, %24 : vector<16x128xf32>
      %cst_23 = arith.constant 0.000000e+00 : f32
      %26 = vector.broadcast %cst_23 : f32 to vector<16x128xf32>
      %27 = arith.maximumf %25, %26 : vector<16x128xf32>
      %28 = arith.truncf %27 : vector<16x128xf32> to vector<16x128xbf16>
      %c0_24 = arith.constant 0 : index
      %c0_25 = arith.constant 0 : index
      %29 = vector.load %arg8[%c0_24, %c0_25] : memref<16x128xbf16, #tpu.memory_space<vmem>>, vector<16x128xbf16>
      tpu.vector_store %arg8[%c0_24, %c0_25], %28 {strides = array<i32>} : memref<16x128xbf16, #tpu.memory_space<vmem>>, vector<16x128xbf16>,
    } else {
    }
    return
  }
  func.func @transform_0(%arg0: i32, %arg1: i32) -> (i32, i32) {
    %c0_i32 = arith.constant 0 : i32
    return %arg0, %arg1 : i32, i32
  }
  func.func @transform_1(%arg0: i32, %arg1: i32) -> (i32, i32) {
    %c0_i32 = arith.constant 0 : i32
    %c0_i32_0 = arith.constant 0 : i32
    return %arg1, %c0_i32 : i32, i32
  }
  func.func @transform_2(%arg0: i32, %arg1: i32) -> (i32, i32) {
    %c0_i32 = arith.constant 0 : i32
    %c0_i32_0 = arith.constant 0 : i32
    return %arg0, %c0_i32 : i32, i32
  }
  func.func @transform_3(%arg0: i32, %arg1: i32) -> (i32, i32) {
    %c0_i32 = arith.constant 0 : i32
    %c0_i32_0 = arith.constant 0 : i32
    return %arg0, %c0_i32 : i32, i32
  }
  func.func @transform_4(%arg0: i32, %arg1: i32) -> (i32, i32) {
    %c0_i32 = arith.constant 0 : i32
    %c0_i32_0 = arith.constant 0 : i32
    %c0_i32_1 = arith.constant 0 : i32
    return %c0_i32, %c0_i32_0 : i32, i32
  }
  func.func @transform_5(%arg0: i32, %arg1: i32) -> (i32, i32) {
    %c0_i32 = arith.constant 0 : i32
    %c0_i32_0 = arith.constant 0 : i32
    %c0_i32_1 = arith.constant 0 : i32
    return %c0_i32, %c0_i32_0 : i32, i32
  }
  func.func @transform_6(%arg0: i32, %arg1: i32) -> (i32, i32) {
    %c0_i32 = arith.constant 0 : i32
    %c0_i32_0 = arith.constant 0 : i32
    return %arg0, %c0_i32 : i32, i32
  }
}

module attributes {stable_mosaic.version = 11 : i64} {
  func.func @_fused_sage_layer_kernel(%arg0: i32, %arg1: i32, %arg2: memref<16x16xbf16, #tpu.memory_space<vmem>>, %arg3: memref<16x128xbf16, #tpu.memory_space<vmem>>, %arg4: memref<16x1xf32, #tpu.memory_space<vmem>>, %arg5: memref<16x128xbf16, #tpu.memory_space<vmem>>, %arg6: memref<256x128xbf16, #tpu.memory_space<vmem>>, %arg7: memref<1x128xf32, #tpu.memory_space<vmem>>, %arg8: memref<16x128xf32, #tpu.memory_space<vmem>>, %arg9: memref<16x128xf32, #tpu.memory_space<vmem>>) attributes {dimension_semantics = [#tpu.dimension_semantics<parallel>, #tpu.dimension_semantics<arbitrary>], iteration_bounds = array<i64: 1, 1>, scalar_prefetch = 0 : i64, scratch_operands = 1 : i64, tpu.core_type = #tpu.core_type<tc>, window_params = [{transform_indices = @transform_0, window_bounds = array<i64: 16, 16>}, {transform_indices = @transform_1, window_bounds = array<i64: 16, 128>}, {transform_indices = @transform_2, window_bounds = array<i64: 16, 1>}, {transform_indices = @transform_3, window_bounds = array<i64: 16, 128>}, {pipeline_mode = #tpu.pipeline_mode<synchronous>, transform_indices = @transform_4, window_bounds = array<i64: 256, 128>}, {pipeline_mode = #tpu.pipeline_mode<synchronous>, transform_indices = @transform_5, window_bounds = array<i64: 1, 128>}, {transform_indices = @transform_6, window_bounds = array<i64: 16, 128>}]} {
    %c0_i32 = arith.constant 0 : i32
    %0 = arith.cmpi eq, %arg1, %c0_i32 : i32
    %1 = arith.extui %0 : i1 to i32
    %c0_i32_0 = arith.constant 0 : i32
    %2 = arith.cmpi ne, %1, %c0_i32_0 : i32
    scf.if %2 {
      %cst_10 = arith.constant 0.000000e+00 : f32
      %12 = vector.broadcast %cst_10 : f32 to vector<16x128xf32>
      %c0_11 = arith.constant 0 : index
      %c0_12 = arith.constant 0 : index
      %13 = vector.load %arg9[%c0_11, %c0_12] : memref<16x128xf32, #tpu.memory_space<vmem>>, vector<16x128xf32>
      tpu.vector_store %arg9[%c0_11, %c0_12], %12 {strides = array<i32>} : memref<16x128xf32, #tpu.memory_space<vmem>>, vector<16x128xf32>,
    } else {
    }
    %c0 = arith.constant 0 : index
    %c0_1 = arith.constant 0 : index
    %3 = vector.load %arg9[%c0, %c0_1] : memref<16x128xf32, #tpu.memory_space<vmem>>, vector<16x128xf32>
    %c0_2 = arith.constant 0 : index
    %c0_3 = arith.constant 0 : index
    %4 = vector.load %arg2[%c0_2, %c0_3] : memref<16x16xbf16, #tpu.memory_space<vmem>>, vector<16x16xbf16>
    %c0_4 = arith.constant 0 : index
    %c0_5 = arith.constant 0 : index
    %5 = vector.load %arg3[%c0_4, %c0_5] : memref<16x128xbf16, #tpu.memory_space<vmem>>, vector<16x128xbf16>
    %cst = arith.constant dense<0.000000e+00> : vector<16x128xf32>
    %6 = tpu.matmul %4, %5, %cst {dimension_numbers = #tpu.dot_dimension_numbers<[1], [0], [0], [1], [0, 0, 1, 1], [], []>} : vector<16x16xbf16>, vector<16x128xbf16>, vector<16x128xf32> -> vector<16x128xf32>
    %7 = arith.addf %3, %6 : vector<16x128xf32>
    %c0_6 = arith.constant 0 : index
    %c0_7 = arith.constant 0 : index
    %8 = vector.load %arg9[%c0_6, %c0_7] : memref<16x128xf32, #tpu.memory_space<vmem>>, vector<16x128xf32>
    tpu.vector_store %arg9[%c0_6, %c0_7], %7 {strides = array<i32>} : memref<16x128xf32, #tpu.memory_space<vmem>>, vector<16x128xf32>,
    %c0_i32_8 = arith.constant 0 : i32
    %9 = arith.cmpi eq, %arg1, %c0_i32_8 : i32
    %10 = arith.extui %9 : i1 to i32
    %c0_i32_9 = arith.constant 0 : i32
    %11 = arith.cmpi ne, %10, %c0_i32_9 : i32
    scf.if %11 {
      %c0_10 = arith.constant 0 : index
      %c0_11 = arith.constant 0 : index
      %12 = vector.load %arg9[%c0_10, %c0_11] : memref<16x128xf32, #tpu.memory_space<vmem>>, vector<16x128xf32>
      %c0_12 = arith.constant 0 : index
      %c0_13 = arith.constant 0 : index
      %13 = vector.load %arg4[%c0_12, %c0_13] : memref<16x1xf32, #tpu.memory_space<vmem>>, vector<16x1xf32>
      %14 = vector.broadcast %13 : vector<16x1xf32> to vector<16x128xf32>
      %15 = arith.mulf %12, %14 : vector<16x128xf32>
      %16 = arith.truncf %15 : vector<16x128xf32> to vector<16x128xbf16>
      %c0_14 = arith.constant 0 : index
      %c0_15 = arith.constant 0 : index
      %17 = vector.load %arg6[%c0_14, %c0_15] : memref<256x128xbf16, #tpu.memory_space<vmem>>, vector<128x128xbf16>
      %cst_16 = arith.constant dense<0.000000e+00> : vector<16x128xf32>
      %18 = tpu.matmul %16, %17, %cst_16 {dimension_numbers = #tpu.dot_dimension_numbers<[1], [0], [0], [1], [0, 0, 1, 1], [], []>} : vector<16x128xbf16>, vector<128x128xbf16>, vector<16x128xf32> -> vector<16x128xf32>
      %c0_17 = arith.constant 0 : index
      %c0_18 = arith.constant 0 : index
      %19 = vector.load %arg5[%c0_17, %c0_18] : memref<16x128xbf16, #tpu.memory_space<vmem>>, vector<16x128xbf16>
      %c128 = arith.constant 128 : index
      %c0_19 = arith.constant 0 : index
      %20 = vector.load %arg6[%c128, %c0_19] : memref<256x128xbf16, #tpu.memory_space<vmem>>, vector<128x128xbf16>
      %cst_20 = arith.constant dense<0.000000e+00> : vector<16x128xf32>
      %21 = tpu.matmul %19, %20, %cst_20 {dimension_numbers = #tpu.dot_dimension_numbers<[1], [0], [0], [1], [0, 0, 1, 1], [], []>} : vector<16x128xbf16>, vector<128x128xbf16>, vector<16x128xf32> -> vector<16x128xf32>
      %22 = arith.addf %18, %21 : vector<16x128xf32>
      %c0_21 = arith.constant 0 : index
      %c0_22 = arith.constant 0 : index
      %23 = vector.load %arg7[%c0_21, %c0_22] : memref<1x128xf32, #tpu.memory_space<vmem>>, vector<1x128xf32>
      %24 = vector.broadcast %23 : vector<1x128xf32> to vector<16x128xf32>
      %25 = arith.addf %22, %24 : vector<16x128xf32>
      %c0_23 = arith.constant 0 : index
      %c0_24 = arith.constant 0 : index
      %26 = vector.load %arg8[%c0_23, %c0_24] : memref<16x128xf32, #tpu.memory_space<vmem>>, vector<16x128xf32>
      tpu.vector_store %arg8[%c0_23, %c0_24], %25 {strides = array<i32>} : memref<16x128xf32, #tpu.memory_space<vmem>>, vector<16x128xf32>,
    } else {
    }
    return
  }
  func.func @transform_0(%arg0: i32, %arg1: i32) -> (i32, i32) {
    %c0_i32 = arith.constant 0 : i32
    return %arg0, %arg1 : i32, i32
  }
  func.func @transform_1(%arg0: i32, %arg1: i32) -> (i32, i32) {
    %c0_i32 = arith.constant 0 : i32
    %c0_i32_0 = arith.constant 0 : i32
    return %arg1, %c0_i32 : i32, i32
  }
  func.func @transform_2(%arg0: i32, %arg1: i32) -> (i32, i32) {
    %c0_i32 = arith.constant 0 : i32
    %c0_i32_0 = arith.constant 0 : i32
    return %arg0, %c0_i32 : i32, i32
  }
  func.func @transform_3(%arg0: i32, %arg1: i32) -> (i32, i32) {
    %c0_i32 = arith.constant 0 : i32
    %c0_i32_0 = arith.constant 0 : i32
    return %arg0, %c0_i32 : i32, i32
  }
  func.func @transform_4(%arg0: i32, %arg1: i32) -> (i32, i32) {
    %c0_i32 = arith.constant 0 : i32
    %c0_i32_0 = arith.constant 0 : i32
    %c0_i32_1 = arith.constant 0 : i32
    return %c0_i32, %c0_i32_0 : i32, i32
  }
  func.func @transform_5(%arg0: i32, %arg1: i32) -> (i32, i32) {
    %c0_i32 = arith.constant 0 : i32
    %c0_i32_0 = arith.constant 0 : i32
    %c0_i32_1 = arith.constant 0 : i32
    return %c0_i32, %c0_i32_0 : i32, i32
  }
  func.func @transform_6(%arg0: i32, %arg1: i32) -> (i32, i32) {
    %c0_i32 = arith.constant 0 : i32
    %c0_i32_0 = arith.constant 0 : i32
    return %arg0, %c0_i32 : i32, i32
  }
}

</mosaic_0001>

<bundles_post_ra>
// kernel: variational_graph_sage_encoder.2
= control target key start
LH: loop header
LB: loop body
LE: loop exit
PB: predicated region body
PF: predicated region fallthrough
CT: control target
= control target key end

     0   :  { %v478_v0 = vmov 0.0   ;;  %vm479_vm0 = vmmov 0   ;;  %v480_v3 = vmov 0   ;;  %vm47_vm1 = vcmask 130048   ;;  %s588_s1 = inlined_call_operand.vmem [shape: bf16[16,128], index: 1, kind: input, shape index: {}, may-alias: {1,3}]   ;;  %s589_s0 = inlined_call_operand.vmem [shape: bf16[16,16], index: 0, kind: input, shape index: {}]   ;;  %s590_s2 = inlined_call_operand.vmem [shape: f32[16,1], index: 2, kind: input, shape index: {}]   ;;  %s591_s4 = inlined_call_operand.vmem [shape: bf16[256,128], index: 4, kind: input, shape index: {}]   ;;  %s592_s3 = inlined_call_operand.vmem [shape: bf16[16,128], index: 3, kind: input, shape index: {}, may-alias: {1,3}]   ;;  %s593_s5 = inlined_call_operand.vmem [shape: f32[1,128], index: 5, kind: input, shape index: {}]   ;;  %s594_s6 = inlined_call_operand.vmem [shape: bf16[16,128], index: 6, kind: output, shape index: {}]  }
   0x1   :  { %409 = vmatprep.subr.bf16.mxu0 %v478_v0  ;;  %v459_v1 = vld [vmem:[%s588_s1] sm:$0xff]   ;;  %411 = vmatprep.mubr.msk.bf16.mxu0 %vm479_vm0, %v478_v0  ;;  %v102_v5 = vld [vmem:[%s590_s2 + $0x8] sm:$0xff]  ;;  %v465_v10 = vld [vmem:[%s591_s4 + $0x50] sm:$0xff]  }
   0x2   :  { %v460_v2 = vld [vmem:[%s589_s0] sm:$0xff]   ;;  %458 = vset.pattern.permute.xlu0 %v480_v3  ;;  %415 = vmatprep.subr.bf16.mxu1 %v478_v0  ;;  %v463_v8 = vld [vmem:[%s591_s4 + $0x48] sm:$0xff]   ;;  %v466_v11 = vld [vmem:[%s591_s4 + $0x10] sm:$0xff]  }
   0x3   :  { %410 = vmatpush3.bf16.msra.mxu0 %v459_v1  ;;  %v101_v4 = vld [vmem:[%s590_s2] sm:$0xff]  ;;  %431 = vmatprep.mubr.msk.bf16.mxu1 %vm479_vm0, %v478_v0  ;;  %v464_v9 = vld [vmem:[%s591_s4 + $0x8] sm:$0xff]   ;;  %v467_v12 = vld [vmem:[%s591_s4 + $0x58] sm:$0xff]  }
   0x4   :  { %105 = vperm.xlu0 %458, %v101_v4   ;;  %v461_v6 = vld [vmem:[%s591_s4 + $0x40] sm:$0xff]   ;;  %435 = vmatprep.subr.bf16.mxu0 %v478_v0  ;;  %v468_v13 = vld [vmem:[%s591_s4 + $0x18] sm:$0xff]   ;;  %v471_v16 = vld [vmem:[%s591_s4 + $0x68] sm:$0xff]  }
   0x5   :  { %v462_v7 = vld [vmem:[%s591_s4] sm:$0xff]   ;;  %416 = vmatpush3.bf16.msra.mxu1 %v461_v6  ;;  %v472_v17 = vld [vmem:[%s591_s4 + $0x28] sm:$0xff]   ;;  %v473_v18 = vld [vmem:[%s591_s4 + $0x70] sm:$0xff]  }
   0x6   :  { %412 = vmatmul.mubr.msk.bf16.vlgmr.msra.gmra.mrb[0].mxu0 %vm47_vm1, %v460_v2  ;;  %417 = vmatprep.subr.bf16.mxu1 %v478_v0  ;;  %v469_v14 = vld [vmem:[%s591_s4 + $0x60] sm:$0xff]   ;;  %v474_v19 = vld [vmem:[%s591_s4 + $0x30] sm:$0xff]   ;;  %v475_v20 = vld [vmem:[%s591_s4 + $0x78] sm:$0xff]  }
   0x7   :  { %436 = vmatpush3.bf16.msra.mxu0 %v462_v7  ;;  %451 = vmatprep.mubr.msk.bf16.mxu0 %vm479_vm0, %v478_v0  ;;  %v470_v15 = vld [vmem:[%s591_s4 + $0x20] sm:$0xff]   ;;  %v477_v22 = vld [vmem:[%s591_s4 + $0x38] sm:$0xff]  }
   0x8   :  { %110 = vperm.xlu0 %458, %v102_v5   ;;  %437 = vmatprep.subr.bf16.mxu0 %v478_v0  ;;  %v476_v21 = vld [vmem:[%s592_s3] sm:$0xff]  }
   0x9   :  { %418 = vmatpush3.bf16.msra.mxu1 %v463_v8  ;;  %v379_v37 = vld [vmem:[%s593_s5] ss:$0 sm:$0xff] }
   0xa   :  { %419 = vmatprep.subr.bf16.mxu1 %v478_v0 }
   0xb   :  { %438 = vmatpush3.bf16.msra.mxu0 %v464_v9 }
   0xc   :  { %439 = vmatprep.subr.bf16.mxu0 %v478_v0 }
   0xd   :  { %420 = vmatpush3.bf16.msra.mxu1 %v465_v10 }
   0xe   :  { %421 = vmatprep.subr.bf16.mxu1 %v478_v0 }
   0xf   :  { %440 = vmatpush3.bf16.msra.mxu0 %v466_v11 }
  0x10   :  { %441 = vmatprep.subr.bf16.mxu0 %v478_v0 }
  0x11   :  { %422 = vmatpush3.bf16.msra.mxu1 %v467_v12 }
  0x12   :  { %423 = vmatprep.subr.bf16.mxu1 %v478_v0 }
  0x13   :  { %442 = vmatpush3.bf16.msra.mxu0 %v468_v13 }
  0x14   :  { %443 = vmatprep.subr.bf16.mxu0 %v478_v0 }
  0x15   :  { %424 = vmatpush3.bf16.msra.mxu1 %v469_v14 }
  0x16   :  { %425 = vmatprep.subr.bf16.mxu1 %v478_v0 }
  0x17   :  { %444 = vmatpush3.bf16.msra.mxu0 %v470_v15 }
  0x18   :  { %445 = vmatprep.subr.bf16.mxu0 %v478_v0 }
  0x19   :  { %426 = vmatpush3.bf16.msra.mxu1 %v471_v16 }
  0x1a   :  { %427 = vmatprep.subr.bf16.mxu1 %v478_v0 }
  0x1b   :  { %446 = vmatpush3.bf16.msra.mxu0 %v472_v17 }
  0x1c   :  { %447 = vmatprep.subr.bf16.mxu0 %v478_v0 }
  0x1d   :  { %428 = vmatpush3.bf16.msra.mxu1 %v473_v18 }
  0x1e   :  { %429 = vmatprep.subr.bf16.mxu1 %v478_v0 }
  0x1f   :  { %448 = vmatpush3.bf16.msra.mxu0 %v474_v19 }
  0x20   :  { %449 = vmatprep.subr.bf16.mxu0 %v478_v0 }
  0x21   :  { %430 = vmatpush3.bf16.msra.mxu1 %v475_v20 }
  0x23   :  { %450 = vmatpush3.bf16.msra.mxu0 %v477_v22 }
  0x24   :  { %432 = vmatmul.mubr.bf16.vlgmr.msra.gmra.mrb[0].mxu1 %v476_v21 }
  0x83   :  { %v106_v23 = vpop.permute.xlu0 %105 }
  0x87   :  { %v111_v26 = vpop.permute.xlu0 %110 }
  0xd9   :  { %v85_v24 = vpop.f32.mrb[0].mxu0 }
  0xda   :  { %v413_v25 = vpop.f32.mrb[1].mxu0  ;;  %v113_v28 = vmul.f32 %v106_v23, %v85_v24 }
  0xdb   :  { %v88_v27 = vpop.f32.mrb[2].mxu0 }
  0xdc   :  { %v114_v29 = vmul.f32 %v111_v26, %v88_v27  ;;  %v414_v30 = vpop.f32.mrb[3].mxu0 }
  0xde   :  { %v115_v31 = vpack.c.bf16 %v114_v29, %v113_v28 }
  0xe0   :  { %452 = vmatmul.mubr.bf16.vlgmr.msra.gmra.mrb[4].mxu0 %v115_v31 }
  0xf7   :  { %v238_v32 = vpop.f32.mrb[0].mxu1 }
  0xf8   :  { %v433_v33 = vpop.f32.mrb[1].mxu1 }
  0xf9   :  { %v241_v34 = vpop.f32.mrb[2].mxu1 }
  0xfa   :  { %v434_v35 = vpop.f32.mrb[3].mxu1 }
 0x1b3   :  { %v327_v36 = vpop.f32.mrb[4].mxu0 }
 0x1b4   :  { %v328_v38 = vadd.f32 %v327_v36, %v238_v32  ;;  %v453_v39 = vpop.f32.mrb[5].mxu0 }
 0x1b5   :  { %v330_v40 = vpop.f32.mrb[6].mxu0 }
 0x1b6   :  { %v341_v41 = vadd.f32 %v379_v37, %v328_v38  ;;  %v331_v42 = vadd.f32 %v330_v40, %v241_v34  ;;  %v454_v43 = vpop.f32.mrb[7].mxu0 }
 0x1b8   :  { %v342_v44 = vadd.f32 %v379_v37, %v331_v42  ;;  %v343_v45 = vmax.f32 %v341_v41, 0.0 }
 0x1ba   :  { %v344_v46 = vmax.f32 %v342_v44, 0.0 }
 0x1bc   :  { %v387_v47 = vpack.c.bf16 %v344_v46, %v343_v45 }
 0x1be   :  { %388 = vst [vmem:[%s594_s6] sm:$0xff] %v387_v47  }

// kernel: variational_graph_sage_encoder.3
= control target key start
LH: loop header
LB: loop body
LE: loop exit
PB: predicated region body
PF: predicated region fallthrough
CT: control target
= control target key end

     0   :  { %v459_v0 = vmov 0.0   ;;  %vm460_vm0 = vmmov 0   ;;  %v461_v3 = vmov 0   ;;  %vm47_vm1 = vcmask 130048   ;;  %s572_s1 = inlined_call_operand.vmem [shape: bf16[16,128], index: 1, kind: input, shape index: {}, may-alias: {1,3}]   ;;  %s573_s0 = inlined_call_operand.vmem [shape: bf16[16,16], index: 0, kind: input, shape index: {}]   ;;  %s574_s2 = inlined_call_operand.vmem [shape: f32[16,1], index: 2, kind: input, shape index: {}]   ;;  %s575_s4 = inlined_call_operand.vmem [shape: bf16[256,128], index: 4, kind: input, shape index: {}]   ;;  %s576_s3 = inlined_call_operand.vmem [shape: bf16[16,128], index: 3, kind: input, shape index: {}, may-alias: {1,3}]   ;;  %s577_s5 = inlined_call_operand.vmem [shape: f32[1,128], index: 5, kind: input, shape index: {}]   ;;  %s578_s6 = inlined_call_operand.vmem [shape: f32[16,128], index: 6, kind: output, shape index: {}]  }
   0x1   :  { %390 = vmatprep.subr.bf16.mxu0 %v459_v0  ;;  %v440_v1 = vld [vmem:[%s572_s1] sm:$0xff]   ;;  %392 = vmatprep.mubr.msk.bf16.mxu0 %vm460_vm0, %v459_v0  ;;  %v102_v5 = vld [vmem:[%s574_s2 + $0x8] sm:$0xff]  ;;  %v446_v10 = vld [vmem:[%s575_s4 + $0x50] sm:$0xff]  }
   0x2   :  { %v441_v2 = vld [vmem:[%s573_s0] sm:$0xff]   ;;  %439 = vset.pattern.permute.xlu0 %v461_v3  ;;  %396 = vmatprep.subr.bf16.mxu1 %v459_v0  ;;  %v444_v8 = vld [vmem:[%s575_s4 + $0x48] sm:$0xff]   ;;  %v447_v11 = vld [vmem:[%s575_s4 + $0x10] sm:$0xff]  }
   0x3   :  { %391 = vmatpush3.bf16.msra.mxu0 %v440_v1  ;;  %v101_v4 = vld [vmem:[%s574_s2] sm:$0xff]  ;;  %412 = vmatprep.mubr.msk.bf16.mxu1 %vm460_vm0, %v459_v0  ;;  %v445_v9 = vld [vmem:[%s575_s4 + $0x8] sm:$0xff]   ;;  %v448_v12 = vld [vmem:[%s575_s4 + $0x58] sm:$0xff]  }
   0x4   :  { %105 = vperm.xlu0 %439, %v101_v4   ;;  %v442_v6 = vld [vmem:[%s575_s4 + $0x40] sm:$0xff]   ;;  %416 = vmatprep.subr.bf16.mxu0 %v459_v0  ;;  %v449_v13 = vld [vmem:[%s575_s4 + $0x18] sm:$0xff]   ;;  %v452_v16 = vld [vmem:[%s575_s4 + $0x68] sm:$0xff]  }
   0x5   :  { %v443_v7 = vld [vmem:[%s575_s4] sm:$0xff]   ;;  %397 = vmatpush3.bf16.msra.mxu1 %v442_v6  ;;  %v453_v17 = vld [vmem:[%s575_s4 + $0x28] sm:$0xff]   ;;  %v454_v18 = vld [vmem:[%s575_s4 + $0x70] sm:$0xff]  }
   0x6   :  { %393 = vmatmul.mubr.msk.bf16.vlgmr.msra.gmra.mrb[0].mxu0 %vm47_vm1, %v441_v2  ;;  %398 = vmatprep.subr.bf16.mxu1 %v459_v0  ;;  %v450_v14 = vld [vmem:[%s575_s4 + $0x60] sm:$0xff]   ;;  %v455_v19 = vld [vmem:[%s575_s4 + $0x30] sm:$0xff]   ;;  %v456_v20 = vld [vmem:[%s575_s4 + $0x78] sm:$0xff]  }
   0x7   :  { %417 = vmatpush3.bf16.msra.mxu0 %v443_v7  ;;  %432 = vmatprep.mubr.msk.bf16.mxu0 %vm460_vm0, %v459_v0  ;;  %v451_v15 = vld [vmem:[%s575_s4 + $0x20] sm:$0xff]   ;;  %v458_v22 = vld [vmem:[%s575_s4 + $0x38] sm:$0xff]  }
   0x8   :  { %110 = vperm.xlu0 %439, %v102_v5   ;;  %418 = vmatprep.subr.bf16.mxu0 %v459_v0  ;;  %v457_v21 = vld [vmem:[%s576_s3] sm:$0xff]  }
   0x9   :  { %399 = vmatpush3.bf16.msra.mxu1 %v444_v8  ;;  %v369_v37 = vld [vmem:[%s577_s5] ss:$0 sm:$0xff] }
   0xa   :  { %400 = vmatprep.subr.bf16.mxu1 %v459_v0 }
   0xb   :  { %419 = vmatpush3.bf16.msra.mxu0 %v445_v9 }
   0xc   :  { %420 = vmatprep.subr.bf16.mxu0 %v459_v0 }
   0xd   :  { %401 = vmatpush3.bf16.msra.mxu1 %v446_v10 }
   0xe   :  { %402 = vmatprep.subr.bf16.mxu1 %v459_v0 }
   0xf   :  { %421 = vmatpush3.bf16.msra.mxu0 %v447_v11 }
  0x10   :  { %422 = vmatprep.subr.bf16.mxu0 %v459_v0 }
  0x11   :  { %403 = vmatpush3.bf16.msra.mxu1 %v448_v12 }
  0x12   :  { %404 = vmatprep.subr.bf16.mxu1 %v459_v0 }
  0x13   :  { %423 = vmatpush3.bf16.msra.mxu0 %v449_v13 }
  0x14   :  { %424 = vmatprep.subr.bf16.mxu0 %v459_v0 }
  0x15   :  { %405 = vmatpush3.bf16.msra.mxu1 %v450_v14 }
  0x16   :  { %406 = vmatprep.subr.bf16.mxu1 %v459_v0 }
  0x17   :  { %425 = vmatpush3.bf16.msra.mxu0 %v451_v15 }
  0x18   :  { %426 = vmatprep.subr.bf16.mxu0 %v459_v0 }
  0x19   :  { %407 = vmatpush3.bf16.msra.mxu1 %v452_v16 }
  0x1a   :  { %408 = vmatprep.subr.bf16.mxu1 %v459_v0 }
  0x1b   :  { %427 = vmatpush3.bf16.msra.mxu0 %v453_v17 }
  0x1c   :  { %428 = vmatprep.subr.bf16.mxu0 %v459_v0 }
  0x1d   :  { %409 = vmatpush3.bf16.msra.mxu1 %v454_v18 }
  0x1e   :  { %410 = vmatprep.subr.bf16.mxu1 %v459_v0 }
  0x1f   :  { %429 = vmatpush3.bf16.msra.mxu0 %v455_v19 }
  0x20   :  { %430 = vmatprep.subr.bf16.mxu0 %v459_v0 }
  0x21   :  { %411 = vmatpush3.bf16.msra.mxu1 %v456_v20 }
  0x23   :  { %431 = vmatpush3.bf16.msra.mxu0 %v458_v22 }
  0x24   :  { %413 = vmatmul.mubr.bf16.vlgmr.msra.gmra.mrb[0].mxu1 %v457_v21 }
  0x83   :  { %v106_v23 = vpop.permute.xlu0 %105 }
  0x87   :  { %v111_v26 = vpop.permute.xlu0 %110 }
  0xd9   :  { %v85_v24 = vpop.f32.mrb[0].mxu0 }
  0xda   :  { %v394_v25 = vpop.f32.mrb[1].mxu0  ;;  %v113_v28 = vmul.f32 %v106_v23, %v85_v24 }
  0xdb   :  { %v88_v27 = vpop.f32.mrb[2].mxu0 }
  0xdc   :  { %v114_v29 = vmul.f32 %v111_v26, %v88_v27  ;;  %v395_v30 = vpop.f32.mrb[3].mxu0 }
  0xde   :  { %v115_v31 = vpack.c.bf16 %v114_v29, %v113_v28 }
  0xe0   :  { %433 = vmatmul.mubr.bf16.vlgmr.msra.gmra.mrb[4].mxu0 %v115_v31 }
  0xf7   :  { %v238_v32 = vpop.f32.mrb[0].mxu1 }
  0xf8   :  { %v414_v33 = vpop.f32.mrb[1].mxu1 }
  0xf9   :  { %v241_v34 = vpop.f32.mrb[2].mxu1 }
  0xfa   :  { %v415_v35 = vpop.f32.mrb[3].mxu1 }
 0x1b3   :  { %v327_v36 = vpop.f32.mrb[4].mxu0 }
 0x1b4   :  { %v328_v38 = vadd.f32 %v327_v36, %v238_v32  ;;  %v434_v39 = vpop.f32.mrb[5].mxu0 }
 0x1b5   :  { %v330_v40 = vpop.f32.mrb[6].mxu0 }
 0x1b6   :  { %v341_v41 = vadd.f32 %v369_v37, %v328_v38  ;;  %v331_v42 = vadd.f32 %v330_v40, %v241_v34  ;;  %v435_v43 = vpop.f32.mrb[7].mxu0 }
 0x1b8   :  { %343 = vst [vmem:[%s578_s6] sm:$0xff] %v341_v41  ;;  %v342_v44 = vadd.f32 %v369_v37, %v331_v42 }
 0x1ba   :  { %344 = vst [vmem:[%s578_s6 + $0x8] sm:$0xff] %v342_v44 }

</bundles_post_ra>
